<compile_context>
chip_gen: v7x
topology: tpu7x:2x2x1
jax: 0.10.0
libtpu: 0.0.40
codegen_flags: <defaults>
</compile_context>

<pallas_src>
import jax
import jax.numpy as jnp
from jax import lax
from jax.experimental import pallas as pl
from jax.experimental.pallas import tpu as pltpu

LANES = 128
SUBLANES = 8
EPS = 1e-6
CHUNK_ROWS = 256        # rows per inner fori_loop chunk (256*128 elements)
MIN_BLOCK_ROWS = 1024   # >=512 KiB f32 per step -> 0.35us/step overhead amortized


def _choose_tiling(rows_main, itemsize):
    """Pick (block_rows, chunk_rows).  rows_main is a positive multiple of 8."""
    # ~4 MiB of input per block per array (8192 rows f32 / 16384 rows bf16);
    # 2 inputs x 2 pipeline buffers ~= 16 MiB VMEM, covered by vmem_limit_bytes.
    max_block_rows = (8192 * 4) // itemsize
    if rows_main <= CHUNK_ROWS:
        return rows_main, rows_main
    if rows_main >= 2 * MIN_BLOCK_ROWS:
        # Target ~8+ grid steps (pipeline overlap; megacore sharding on v7x)
        # without dropping below MIN_BLOCK_ROWS per step.
        block = max(MIN_BLOCK_ROWS, min(max_block_rows, pl.cdiv(rows_main, 8)))
    else:
        # Mid-sized input: at least 2 grid steps so DMA/compute can overlap.
        block = max(CHUNK_ROWS, pl.cdiv(rows_main, 2))
    block = pl.cdiv(block, CHUNK_ROWS) * CHUNK_ROWS
    block = min(block, max_block_rows)
    return block, CHUNK_ROWS


def _make_loss_kernel(block_rows, chunk_rows, num_blocks, last_valid_rows):
    """Kernel writing one lane-dense (8, 128) partial-sum tile per grid step."""
    n_chunks_full = block_rows // chunk_rows
    n_chunks_last = pl.cdiv(last_valid_rows, chunk_rows)
    ragged = last_valid_rows < block_rows
    groups = chunk_rows // SUBLANES

    def kernel(x_ref, y_ref, o_ref):
        def block_sum(n_chunks, valid_rows):
            # Chunked reduction keeps the live elementwise intermediate small
            # (chunk_rows x 128) and accumulates into one (8,128) f32 tile.
            def step(c, acc):
                r0 = pl.multiple_of(c * chunk_rows, chunk_rows)
                x = x_ref[pl.ds(r0, chunk_rows), :].astype(jnp.float32)
                y = y_ref[pl.ds(r0, chunk_rows), :].astype(jnp.float32)
                loss = -y * jnp.log(x + EPS) - (1.0 - y) * jnp.log(1.0 - x + EPS)
                if valid_rows is not None:
                    # Ragged last block: rows past the real data contain
                    # unspecified DMA'd bytes (possibly NaN after log); the
                    # select discards them (never use a multiplicative mask).
                    row = lax.broadcasted_iota(jnp.int32, (chunk_rows, LANES), 0)
                    loss = jnp.where(r0 + row < valid_rows, loss, 0.0)
                return acc + jnp.sum(
                    loss.reshape(groups, SUBLANES, LANES), axis=0)

            return lax.fori_loop(
                0, n_chunks, step, jnp.zeros((SUBLANES, LANES), jnp.float32))

        if not ragged:
            o_ref[...] = block_sum(n_chunks_full, None)
        elif num_blocks == 1:
            o_ref[...] = block_sum(n_chunks_last, last_valid_rows)
        else:
            is_last = pl.program_id(0) == pl.num_programs(0) - 1

            @pl.when(jnp.logical_not(is_last))
            def _():
                o_ref[...] = block_sum(n_chunks_full, None)

            @pl.when(is_last)
            def _():
                o_ref[...] = block_sum(n_chunks_last, last_valid_rows)

    return kernel


def loss_model_global(x, y):
    """Pallas equivalent of torch.mean(-y*log(x+1e-6) - (1-y)*log(1-x+1e-6))."""
    assert x.shape == y.shape
    n_elem = int(x.size)
    assert n_elem > 0

    xf = jnp.ravel(x)
    yf = jnp.ravel(y)

    rows = n_elem // LANES
    rows_main = (rows // SUBLANES) * SUBLANES     # sublane-aligned kernel prefix
    main_elems = rows_main * LANES

    total = jnp.float32(0.0)

    if main_elems:
        if main_elems == n_elem:
            xm, ym = xf, yf                       # whole array; reshape = bitcast
        else:
            xm, ym = xf[:main_elems], yf[:main_elems]
        x2 = xm.reshape(rows_main, LANES)
        y2 = ym.reshape(rows_main, LANES)

        itemsize = max(x.dtype.itemsize, y.dtype.itemsize)
        block_rows, chunk_rows = _choose_tiling(rows_main, itemsize)
        num_blocks = pl.cdiv(rows_main, block_rows)
        last_valid_rows = rows_main - (num_blocks - 1) * block_rows

        in_blk = pl.BlockSpec((block_rows, LANES), lambda i: (i, 0))

        partials = pl.pallas_call(
            _make_loss_kernel(block_rows, chunk_rows, num_blocks, last_valid_rows),
            out_shape=jax.ShapeDtypeStruct((num_blocks * SUBLANES, LANES),
                                           jnp.float32),
            grid_spec=pltpu.PrefetchScalarGridSpec(
                num_scalar_prefetch=0,
                grid=(num_blocks,),
                in_specs=[in_blk, in_blk],
                out_specs=pl.BlockSpec((SUBLANES, LANES), lambda i: (i, 0)),
            ),
            compiler_params=pltpu.CompilerParams(
                dimension_semantics=("parallel",),
                vmem_limit_bytes=48 * 1024 * 1024,
            ),
            cost_estimate=pl.CostEstimate(
                flops=8 * main_elems,
                transcendentals=2 * main_elems,
                bytes_accessed=main_elems * (x.dtype.itemsize + y.dtype.itemsize)
                + num_blocks * SUBLANES * LANES * 4,
            ),
        )(x2, y2)
        total = total + jnp.sum(partials, dtype=jnp.float32)

    if main_elems < n_elem:
        # Tiny tail (< 1024 + 128 elements): plain fused XLA elementwise+reduce.
        xt = xf[main_elems:].astype(jnp.float32)
        yt = yf[main_elems:].astype(jnp.float32)
        tail = -yt * jnp.log(xt + EPS) - (1.0 - yt) * jnp.log(1.0 - xt + EPS)
        total = total + jnp.sum(tail, dtype=jnp.float32)

    return (total / jnp.float32(n_elem)).astype(jnp.float32)


if __name__ == "__main__":
    key = jax.random.PRNGKey(0)
    kx, ky = jax.random.split(key)

    # Small shapes consistent with a prediction/label pair (NCHW-like).
    shape = (2, 4, 16, 16)
    x = jax.random.uniform(kx, shape, dtype=jnp.float32, minval=0.01, maxval=0.99)
    y = (jax.random.uniform(ky, shape, dtype=jnp.float32) > 0.5).astype(jnp.float32)

    out = jax.block_until_ready(loss_model_global(x, y))
    ref = jnp.mean(-y * jnp.log(x + EPS) - (1.0 - y) * jnp.log(1.0 - x + EPS))
    assert jnp.allclose(out, ref, rtol=1e-5, atol=1e-6), (out, ref)

    # Also exercise the ragged-last-block + jnp-tail paths (still small).
    shape2 = (11, 61, 65)  # 43615 elems -> 336 aligned rows + 607-elem tail
    x2 = jax.random.uniform(kx, shape2, dtype=jnp.float32, minval=0.01, maxval=0.99)
    y2 = (jax.random.uniform(ky, shape2, dtype=jnp.float32) > 0.5).astype(jnp.float32)
    out2 = jax.block_until_ready(loss_model_global(x2, y2))
    ref2 = jnp.mean(-y2 * jnp.log(x2 + EPS) - (1.0 - y2) * jnp.log(1.0 - x2 + EPS))
    assert jnp.allclose(out2, ref2, rtol=1e-5, atol=1e-6), (out2, ref2)

    print("KERNEL_OK")
</pallas_src>

<mosaic_0001>
module attributes {stable_mosaic.version = 11 : i64} {
  func.func @kernel(%arg0: i32, %arg1: memref<16x128xf32, #tpu.memory_space<vmem>>, %arg2: memref<16x128xf32, #tpu.memory_space<vmem>>, %arg3: memref<8x128xf32, #tpu.memory_space<vmem>>) attributes {dimension_semantics = [#tpu.dimension_semantics<parallel>], iteration_bounds = array<i64: 1>, scalar_prefetch = 0 : i64, scratch_operands = 0 : i64, tpu.core_type = #tpu.core_type<tc>, window_params = [{transform_indices = @transform_0, window_bounds = array<i64: 16, 128>}, {transform_indices = @transform_1, window_bounds = array<i64: 16, 128>}, {transform_indices = @transform_2, window_bounds = array<i64: 8, 128>}]} {
    %cst = arith.constant 0.000000e+00 : f32
    %0 = vector.broadcast %cst : f32 to vector<8x128xf32>
    %c0_i32 = arith.constant 0 : i32
    %c16_i32 = arith.constant 16 : i32
    %1 = arith.muli %c0_i32, %c16_i32 : i32
    %2 = tpu.assume_multiple %1, 16 : i32
    %3 = arith.index_cast %2 : i32 to index
    %c0 = arith.constant 0 : index
    %4 = vector.load %arg1[%3, %c0] : memref<16x128xf32, #tpu.memory_space<vmem>>, vector<16x128xf32>
    %5 = arith.index_cast %2 : i32 to index
    %c0_0 = arith.constant 0 : index
    %6 = vector.load %arg2[%5, %c0_0] : memref<16x128xf32, #tpu.memory_space<vmem>>, vector<16x128xf32>
    %cst_1 = arith.constant 0.000000e+00 : f32
    %7 = vector.broadcast %cst_1 : f32 to vector<16x128xf32>
    %8 = arith.subf %7, %6 : vector<16x128xf32>
    %cst_2 = arith.constant 9.99999997E-7 : f32
    %9 = vector.broadcast %cst_2 : f32 to vector<16x128xf32>
    %10 = arith.addf %4, %9 : vector<16x128xf32>
    %11 = math.log %10 : vector<16x128xf32>
    %12 = arith.mulf %8, %11 : vector<16x128xf32>
    %cst_3 = arith.constant 1.000000e+00 : f32
    %13 = vector.broadcast %cst_3 : f32 to vector<16x128xf32>
    %14 = arith.subf %13, %6 : vector<16x128xf32>
    %cst_4 = arith.constant 1.000000e+00 : f32
    %15 = vector.broadcast %cst_4 : f32 to vector<16x128xf32>
    %16 = arith.subf %15, %4 : vector<16x128xf32>
    %cst_5 = arith.constant 9.99999997E-7 : f32
    %17 = vector.broadcast %cst_5 : f32 to vector<16x128xf32>
    %18 = arith.addf %16, %17 : vector<16x128xf32>
    %19 = math.log %18 : vector<16x128xf32>
    %20 = arith.mulf %14, %19 : vector<16x128xf32>
    %21 = arith.subf %12, %20 : vector<16x128xf32>
    %22 = vector.shape_cast %21 : vector<16x128xf32> to vector<2x8x128xf32>
    %cst_6 = arith.constant dense<0.000000e+00> : vector<8x128xf32>
    %23 = vector.multi_reduction <add>, %22, %cst_6 [0] : vector<2x8x128xf32> to vector<8x128xf32>
    %24 = arith.addf %0, %23 : vector<8x128xf32>
    %c1_i32 = arith.constant 1 : i32
    %c0_7 = arith.constant 0 : index
    %c0_8 = arith.constant 0 : index
    %25 = vector.load %arg3[%c0_7, %c0_8] : memref<8x128xf32, #tpu.memory_space<vmem>>, vector<8x128xf32>
    tpu.vector_store %arg3[%c0_7, %c0_8], %24 {strides = array<i32>} : memref<8x128xf32, #tpu.memory_space<vmem>>, vector<8x128xf32>,
    return
  }
  func.func @transform_0(%arg0: i32) -> (i32, i32) {
    %c0_i32 = arith.constant 0 : i32
    %c0_i32_0 = arith.constant 0 : i32
    return %arg0, %c0_i32 : i32, i32
  }
  func.func @transform_1(%arg0: i32) -> (i32, i32) {
    %c0_i32 = arith.constant 0 : i32
    %c0_i32_0 = arith.constant 0 : i32
    return %arg0, %c0_i32 : i32, i32
  }
  func.func @transform_2(%arg0: i32) -> (i32, i32) {
    %c0_i32 = arith.constant 0 : i32
    %c0_i32_0 = arith.constant 0 : i32
    return %arg0, %c0_i32 : i32, i32
  }
}

</mosaic_0001>

<bundles_post_ra>
// kernel: tpu_custom_call.1
= control target key start
LH: loop header
LB: loop body
LE: loop exit
PB: predicated region body
PF: predicated region fallthrough
CT: control target
= control target key end

     0   :  { %7 = vsyncpa [#allocation3], 0  ;;  %s228_s0 = inlined_call_operand.hbm [shape: f32[16,128], index: 0, kind: input, shape index: {}]   ;;  %s229_s1 = inlined_call_operand.hbm [shape: f32[16,128], index: 1, kind: input, shape index: {}]   ;;  %s230_s2 = inlined_call_operand.hbm [shape: f32[8,128], index: 2, kind: output, shape index: {}]  }
   0x1   :  { %8 = vsyncpa [#allocation6], 0 }
   0x2   :  { %9 = vsyncpa [#allocation4], 0  ;;  %s172_s9 = smov [#allocation2]   ;;  %s100_s13 = scalar_lea.hbm %s228_s0, 256 }
   0x3   :  { %s15_s10 = sshll.u32 %s172_s9, 4  ;;  %p101_p0 = scmp.ne.s32.totalorder %s228_s0, %s100_s13  ;;  %s16_s10 = int_to_ptr.vmem [resolvable:$true] %s15_s10 }
   0x4   :  { %p104_p1 = scmp.lt.u32.totalorder %s100_s13, %s228_s0 }
   0x6   :  { %p106_p2 = pnand %p104_p1, %p101_p0 }
   0x8   :  { %109 = shalt.err (!%p106_p2)
}
   0x9   :  { %s110_s18 = scalar_lea.vmem %s16_s10, 256  ;;  %p115_p4 = scmp.lt.s32.totalorder %s16_s10, %s16_s10 }
   0xa   :  { %p111_p3 = scmp.ne.s32.totalorder %s16_s10, %s110_s18  ;;  %p116_p5 = scmp.lt.s32.totalorder %s110_s18, %s110_s18 }
   0xc   :  { %p117_p6 = por %p116_p5, %p115_p4 }
   0xe   :  { %p118_p7 = pnand %p117_p6, %p111_p3 }
  0x10   :  { %121 = shalt.err (!%p118_p7)
}
  0x11   :  { %s173_s19 = smov 128   ;;  %s174_s20 = smov 8  }
  0x12   :  { %21 = dma.hbm_to_vmem [thread:$0]  %s228_s0, 256, %s16_s10, [#allocation3], %s173_s19, %s173_s19, %s174_s20  }
  0x13   :  { %s175_s23 = smov [#allocation5]   ;;  %s122_s27 = scalar_lea.hbm %s229_s1, 256 }
  0x14   :  { %s27_s24 = sshll.u32 %s175_s23, 4  ;;  %p123_p8 = scmp.ne.s32.totalorder %s229_s1, %s122_s27  ;;  %s28_s24 = int_to_ptr.vmem [resolvable:$true] %s27_s24 }
  0x15   :  { %p126_p9 = scmp.lt.u32.totalorder %s122_s27, %s229_s1 }
  0x17   :  { %p128_p10 = pnand %p126_p9, %p123_p8 }
  0x19   :  { %131 = shalt.err (!%p128_p10)
}
  0x1a   :  { %s132_s4 = scalar_lea.vmem %s28_s24, 256  ;;  %p137_p12 = scmp.lt.s32.totalorder %s28_s24, %s28_s24 }
  0x1b   :  { %p133_p11 = scmp.ne.s32.totalorder %s28_s24, %s132_s4  ;;  %p138_p13 = scmp.lt.s32.totalorder %s132_s4, %s132_s4 }
  0x1d   :  { %p139_p0 = por %p138_p13, %p137_p12 }
  0x1f   :  { %p140_p1 = pnand %p139_p0, %p133_p11 }
  0x21   :  { %143 = shalt.err (!%p140_p1)
}
  0x22   :  { %33 = dma.hbm_to_vmem [thread:$0]  %s229_s1, 256, %s28_s24, [#allocation6], %s173_s19, %s173_s19, %s174_s20  }
  0x23   :  { %166 = dma.done.wait [#allocation3], 256  }
  0x24   :  { %167 = vsyncadd [#allocation3], 4294967040 }
  0x25   :  { %168 = dma.done.wait [#allocation6], 256  }
  0x26   :  { %169 = vsyncadd [#allocation6], 4294967040  ;;  %v40_v0 = vld [vmem:[#allocation2] sm:$0xff]  ;;  %v41_v1 = vld [vmem:[#allocation2 + $0x8] sm:$0xff]  ;;  %s176_s1 = smov [#allocation7]  }
  0x27   :  { %v46_v2 = vadd.f32 1e-06, %v40_v0  ;;  %v47_v3 = vadd.f32 1e-06, %v41_v1  ;;  %v56_v4 = vsub.f32 1.0, %v40_v0  ;;  %v57_v5 = vsub.f32 1.0, %v41_v1 }
  0x28   :  { %v42_v8 = vld [vmem:[#allocation5] sm:$0xff]  ;;  %v43_v9 = vld [vmem:[#allocation5 + $0x8] sm:$0xff]  ;;  %s77_s6 = sshll.u32 %s176_s1, 4  ;;  %s78_s6 = int_to_ptr.vmem [resolvable:$true] %s77_s6 }
  0x29   :  { %92 = vlog2.f32 %v46_v2  ;;  %v58_v6 = vadd.f32 1e-06, %v56_v4  ;;  %v59_v7 = vadd.f32 1e-06, %v57_v5  ;;  %v44_v11 = vsub.f32 0.0, %v42_v8  ;;  %s144_s7 = scalar_lea.vmem %s78_s6, 128  ;;  %p149_p3 = scmp.lt.s32.totalorder %s78_s6, %s78_s6 }
  0x2a   :  { %94 = vlog2.f32 %v47_v3  ;;  %v45_v13 = vsub.f32 0.0, %v43_v9  ;;  %v54_v16 = vsub.f32 1.0, %v42_v8  ;;  %v55_v18 = vsub.f32 1.0, %v43_v9  ;;  %p145_p2 = scmp.ne.s32.totalorder %s78_s6, %s144_s7  ;;  %p150_p4 = scmp.lt.s32.totalorder %s144_s7, %s144_s7 }
  0x2b   :  { %96 = vlog2.f32 %v58_v6 }
  0x2c   :  { %98 = vlog2.f32 %v59_v7  ;;  %p151_p5 = por %p150_p4, %p149_p3 }
  0x2e   :  { %p152_p6 = pnand %p151_p5, %p145_p2 }
  0x33   :  { %v93_v10 = vpop.eup %92 }
  0x34   :  { %v95_v12 = vpop.eup %94  ;;  %v49_v14 = vmul.f32 0.6931472, %v93_v10 }
  0x35   :  { %v51_v15 = vmul.f32 0.6931472, %v95_v12  ;;  %v97_v17 = vpop.eup %96 }
  0x36   :  { %v99_v19 = vpop.eup %98  ;;  %v52_v20 = vmul.f32 %v49_v14, %v44_v11  ;;  %v61_v21 = vmul.f32 0.6931472, %v97_v17 }
  0x37   :  { %v53_v22 = vmul.f32 %v51_v15, %v45_v13  ;;  %v63_v23 = vmul.f32 0.6931472, %v99_v19 }
  0x38   :  { %v64_v24 = vmul.f32 %v61_v21, %v54_v16 }
  0x39   :  { %v65_v25 = vmul.f32 %v63_v23, %v55_v18 }
  0x3a   :  { %v66_v26 = vsub.f32 %v52_v20, %v64_v24 }
  0x3b   :  { %v67_v27 = vsub.f32 %v53_v22, %v65_v25 }
  0x3d   :  { %v68_v28 = vadd.f32 %v67_v27, %v66_v26 }
  0x3f   :  { %70 = vst [vmem:[#allocation7] sm:$0xff] %v68_v28 }
  0x40   :  { %155 = shalt.err (!%p152_p6)
}
  0x41   :  { %s156_s10 = scalar_lea.hbm %s230_s2, 128 }
  0x42   :  { %p157_p7 = scmp.ne.s32.totalorder %s230_s2, %s156_s10  ;;  %p160_p8 = scmp.lt.u32.totalorder %s156_s10, %s230_s2 }
  0x44   :  { %p162_p9 = pnand %p160_p8, %p157_p7 }
  0x46   :  { %165 = shalt.err (!%p162_p9)
}
  0x47   :  { %80 = dma.vmem_to_hbm [thread:$0]  %s78_s6, 128, %s230_s2, [#allocation4]  }
  0x48   :  { %170 = dma.done.wait [#allocation4], 128  }
  0x49   :  { %171 = vsyncadd [#allocation4], 4294967168 }
  0x4a   :  { %84 = vsyncpa [#allocation3], 1 }
  0x4b   :  { %85 = vsyncpa [#allocation6], 1 }
  0x4c   :  { %86 = vsyncpa [#allocation4], 1 }

</bundles_post_ra>
